<compile_context>
chip_gen: v7x
topology: tpu7x:2x2x1
jax: 0.10.0
libtpu: 0.0.40
codegen_flags: <defaults>
</compile_context>

<pallas_src>
import functools

import jax
import jax.numpy as jnp
from jax import lax
from jax.experimental import pallas as pl
from jax.experimental.pallas import tpu as pltpu


def lstm_kernel(x_ref, wih_ref, whh_ref, b_ref, wfc_ref, bfc_ref,
                out_ref, xproj_ref, *, seq_len, batch):
    T, B = seq_len, batch
    H = whh_ref.shape[0]

    # ---- Batched input projection (one MXU op over all T*B rows) -------------
    xproj_ref[...] = (
        jnp.dot(x_ref[...], wih_ref[...], preferred_element_type=jnp.float32)
        + b_ref[...])                                           # (T*B, 4H)

    # ---- Serial recurrence: in-kernel loop, h/c carried as values -------------
    def step(t, carry):
        h, c = carry
        row = pl.multiple_of(t * B, B)
        gates = xproj_ref[pl.ds(row, B), :] + jnp.dot(
            h, whh_ref[...], preferred_element_type=jnp.float32)  # (B, 4H)

        # Full-width transcendentals, then per-gate slices (i, f, g, o).
        sig = jax.nn.sigmoid(gates)
        th = jnp.tanh(gates)
        i_g = sig[:, 0 * H:1 * H]
        f_g = sig[:, 1 * H:2 * H]
        g_g = th[:, 2 * H:3 * H]
        o_g = sig[:, 3 * H:4 * H]

        c_new = f_g * c + i_g * g_g
        h_new = o_g * jnp.tanh(c_new)
        return h_new, c_new

    h0 = jnp.zeros((B, H), jnp.float32)
    c0 = jnp.zeros((B, H), jnp.float32)
    hT, _ = lax.fori_loop(0, T, step, (h0, c0), unroll=True)

    # ---- Final FC on h_T (runs once) ------------------------------------------
    out_ref[...] = (jnp.dot(hT, wfc_ref[...], preferred_element_type=jnp.float32)
                    + bfc_ref[...]).astype(out_ref.dtype)


def simple_lstm_forward(x_btI, w_ih_t, w_hh_t, b_gates, w_fc_t, b_fc):
    """x_btI: (B, T, I) float32. Returns (B, O) float32."""
    B, T, I = x_btI.shape
    H = w_hh_t.shape[0]
    O = w_fc_t.shape[1]

    # Time-major, flattened to (T*B, I) so the input projection is one matmul.
    x_flat = jnp.transpose(x_btI, (1, 0, 2)).reshape(T * B, I)
    b_gates2 = b_gates.reshape(1, 4 * H)
    b_fc2 = b_fc.reshape(1, O)

    kernel = functools.partial(lstm_kernel, seq_len=T, batch=B)

    grid_spec = pltpu.PrefetchScalarGridSpec(
        num_scalar_prefetch=0,
        grid=(1,),                                             # single invocation
        in_specs=[
            pl.BlockSpec((T * B, I), lambda i: (0, 0)),        # x, time-major flat
            pl.BlockSpec((I, 4 * H), lambda i: (0, 0)),        # W_ih^T
            pl.BlockSpec((H, 4 * H), lambda i: (0, 0)),        # W_hh^T
            pl.BlockSpec((1, 4 * H), lambda i: (0, 0)),        # gate bias (b_ih+b_hh)
            pl.BlockSpec((H, O), lambda i: (0, 0)),            # W_fc^T
            pl.BlockSpec((1, O), lambda i: (0, 0)),            # fc bias
        ],
        out_specs=pl.BlockSpec((B, O), lambda i: (0, 0)),
        scratch_shapes=[
            pltpu.VMEM((T * B, 4 * H), jnp.float32),           # x projection
        ],
    )

    return pl.pallas_call(
        kernel,
        out_shape=jax.ShapeDtypeStruct((B, O), jnp.float32),
        grid_spec=grid_spec,
        compiler_params=pltpu.CompilerParams(
            dimension_semantics=("arbitrary",)),
    )(x_flat, w_ih_t, w_hh_t, b_gates2, w_fc_t, b_fc2)


def simple_lstm_reference(x_btI, w_ih_t, w_hh_t, b_gates, w_fc_t, b_fc):
    """Pure-JAX reference matching PyTorch nn.LSTM(batch_first=True) + Linear."""
    B, T, I = x_btI.shape
    H = w_hh_t.shape[0]

    def step(carry, x_t):
        h, c = carry
        gates = x_t @ w_ih_t + h @ w_hh_t + b_gates
        i_g = jax.nn.sigmoid(gates[:, 0 * H:1 * H])
        f_g = jax.nn.sigmoid(gates[:, 1 * H:2 * H])
        g_g = jnp.tanh(gates[:, 2 * H:3 * H])
        o_g = jax.nn.sigmoid(gates[:, 3 * H:4 * H])
        c = f_g * c + i_g * g_g
        h = o_g * jnp.tanh(c)
        return (h, c), None

    h0 = jnp.zeros((B, H), jnp.float32)
    c0 = jnp.zeros((B, H), jnp.float32)
    (hT, _), _ = lax.scan(step, (h0, c0), jnp.transpose(x_btI, (1, 0, 2)))
    return hT @ w_fc_t + b_fc


if __name__ == "__main__":
    # Small shapes consistent with SimpleLSTM(input_size, hidden_size, output_size)
    B, T, I, H, O = 8, 8, 32, 32, 16

    key = jax.random.PRNGKey(0)
    k = iter(jax.random.split(key, 8))
    scale = 1.0 / jnp.sqrt(jnp.float32(H))  # PyTorch-style uniform(-1/sqrt(H), 1/sqrt(H))

    x = jax.random.normal(next(k), (B, T, I), dtype=jnp.float32)

    # Parameters (transposed relative to PyTorch storage; gate order i, f, g, o).
    w_ih_t = jax.random.uniform(next(k), (I, 4 * H), jnp.float32, -scale, scale)
    w_hh_t = jax.random.uniform(next(k), (H, 4 * H), jnp.float32, -scale, scale)
    b_ih = jax.random.uniform(next(k), (4 * H,), jnp.float32, -scale, scale)
    b_hh = jax.random.uniform(next(k), (4 * H,), jnp.float32, -scale, scale)
    b_gates = b_ih + b_hh
    w_fc_t = jax.random.uniform(next(k), (H, O), jnp.float32, -scale, scale)
    b_fc = jax.random.uniform(next(k), (O,), jnp.float32, -scale, scale)

    out = simple_lstm_forward(x, w_ih_t, w_hh_t, b_gates, w_fc_t, b_fc)
    out = jax.block_until_ready(out)

    ref = simple_lstm_reference(x, w_ih_t, w_hh_t, b_gates, w_fc_t, b_fc)
    assert out.shape == (B, O)
    assert jnp.allclose(out, ref, atol=1e-5, rtol=1e-5), "mismatch vs reference"

    print("KERNEL_OK")
</pallas_src>

<mosaic_0001>
module attributes {stable_mosaic.version = 11 : i64} {
  func.func @lstm_kernel(%arg0: i32, %arg1: memref<64x32xf32, #tpu.memory_space<vmem>>, %arg2: memref<32x128xf32, #tpu.memory_space<vmem>>, %arg3: memref<32x128xf32, #tpu.memory_space<vmem>>, %arg4: memref<1x128xf32, #tpu.memory_space<vmem>>, %arg5: memref<32x16xf32, #tpu.memory_space<vmem>>, %arg6: memref<1x16xf32, #tpu.memory_space<vmem>>, %arg7: memref<8x16xf32, #tpu.memory_space<vmem>>, %arg8: memref<64x128xf32, #tpu.memory_space<vmem>>) attributes {dimension_semantics = [#tpu.dimension_semantics<arbitrary>], iteration_bounds = array<i64: 1>, scalar_prefetch = 0 : i64, scratch_operands = 1 : i64, tpu.core_type = #tpu.core_type<tc>, window_params = [{pipeline_mode = #tpu.pipeline_mode<synchronous>, transform_indices = @transform_0, window_bounds = array<i64: 64, 32>}, {pipeline_mode = #tpu.pipeline_mode<synchronous>, transform_indices = @transform_1, window_bounds = array<i64: 32, 128>}, {pipeline_mode = #tpu.pipeline_mode<synchronous>, transform_indices = @transform_2, window_bounds = array<i64: 32, 128>}, {pipeline_mode = #tpu.pipeline_mode<synchronous>, transform_indices = @transform_3, window_bounds = array<i64: 1, 128>}, {pipeline_mode = #tpu.pipeline_mode<synchronous>, transform_indices = @transform_4, window_bounds = array<i64: 32, 16>}, {pipeline_mode = #tpu.pipeline_mode<synchronous>, transform_indices = @transform_5, window_bounds = array<i64: 1, 16>}, {pipeline_mode = #tpu.pipeline_mode<synchronous>, transform_indices = @transform_6, window_bounds = array<i64: 8, 16>}]} {
    %c0 = arith.constant 0 : index
    %c0_0 = arith.constant 0 : index
    %0 = vector.load %arg1[%c0, %c0_0] : memref<64x32xf32, #tpu.memory_space<vmem>>, vector<64x32xf32>
    %c0_1 = arith.constant 0 : index
    %c0_2 = arith.constant 0 : index
    %1 = vector.load %arg2[%c0_1, %c0_2] : memref<32x128xf32, #tpu.memory_space<vmem>>, vector<32x128xf32>
    %cst = arith.constant dense<0.000000e+00> : vector<64x128xf32>
    %2 = tpu.matmul %0, %1, %cst {dimension_numbers = #tpu.dot_dimension_numbers<[1], [0], [0], [1], [0, 0, 1, 1], [], []>} : vector<64x32xf32>, vector<32x128xf32>, vector<64x128xf32> -> vector<64x128xf32>
    %c0_3 = arith.constant 0 : index
    %c0_4 = arith.constant 0 : index
    %3 = vector.load %arg4[%c0_3, %c0_4] : memref<1x128xf32, #tpu.memory_space<vmem>>, vector<1x128xf32>
    %4 = vector.broadcast %3 : vector<1x128xf32> to vector<64x128xf32>
    %5 = arith.addf %2, %4 : vector<64x128xf32>
    %c0_5 = arith.constant 0 : index
    %c0_6 = arith.constant 0 : index
    %6 = vector.load %arg8[%c0_5, %c0_6] : memref<64x128xf32, #tpu.memory_space<vmem>>, vector<64x128xf32>
    tpu.vector_store %arg8[%c0_5, %c0_6], %5 {strides = array<i32>} : memref<64x128xf32, #tpu.memory_space<vmem>>, vector<64x128xf32>,
    %cst_7 = arith.constant 0.000000e+00 : f32
    %7 = vector.broadcast %cst_7 : f32 to vector<8x32xf32>
    %cst_8 = arith.constant 0.000000e+00 : f32
    %8 = vector.broadcast %cst_8 : f32 to vector<8x32xf32>
    %c0_i32 = arith.constant 0 : i32
    %c8_i32 = arith.constant 8 : i32
    %9 = arith.muli %c0_i32, %c8_i32 : i32
    %10 = tpu.assume_multiple %9, 8 : i32
    %11 = arith.index_cast %10 : i32 to index
    %c0_9 = arith.constant 0 : index
    %12 = vector.load %arg8[%11, %c0_9] : memref<64x128xf32, #tpu.memory_space<vmem>>, vector<8x128xf32>
    %c0_10 = arith.constant 0 : index
    %c0_11 = arith.constant 0 : index
    %13 = vector.load %arg3[%c0_10, %c0_11] : memref<32x128xf32, #tpu.memory_space<vmem>>, vector<32x128xf32>
    %cst_12 = arith.constant dense<0.000000e+00> : vector<8x128xf32>
    %14 = tpu.matmul %7, %13, %cst_12 {dimension_numbers = #tpu.dot_dimension_numbers<[1], [0], [0], [1], [0, 0, 1, 1], [], []>} : vector<8x32xf32>, vector<32x128xf32>, vector<8x128xf32> -> vector<8x128xf32>
    %15 = arith.addf %12, %14 : vector<8x128xf32>
    %16 = arith.negf %15 : vector<8x128xf32>
    %17 = math.exp %16 : vector<8x128xf32>
    %cst_13 = arith.constant 1.000000e+00 : f32
    %18 = vector.broadcast %cst_13 : f32 to vector<8x128xf32>
    %19 = arith.addf %18, %17 : vector<8x128xf32>
    %20 = arith.divf %18, %19 : vector<8x128xf32>
    %21 = math.tanh %15 : vector<8x128xf32>
    %22 = vector.extract_strided_slice %20 {offsets = [0, 0], sizes = [8, 32], strides = [1, 1]} : vector<8x128xf32> to vector<8x32xf32>
    %23 = vector.extract_strided_slice %20 {offsets = [0, 32], sizes = [8, 32], strides = [1, 1]} : vector<8x128xf32> to vector<8x32xf32>
    %24 = vector.extract_strided_slice %21 {offsets = [0, 64], sizes = [8, 32], strides = [1, 1]} : vector<8x128xf32> to vector<8x32xf32>
    %25 = vector.extract_strided_slice %20 {offsets = [0, 96], sizes = [8, 32], strides = [1, 1]} : vector<8x128xf32> to vector<8x32xf32>
    %26 = arith.mulf %23, %8 : vector<8x32xf32>
    %27 = arith.mulf %22, %24 : vector<8x32xf32>
    %28 = arith.addf %26, %27 : vector<8x32xf32>
    %29 = math.tanh %28 : vector<8x32xf32>
    %30 = arith.mulf %25, %29 : vector<8x32xf32>
    %c1_i32 = arith.constant 1 : i32
    %c8_i32_14 = arith.constant 8 : i32
    %31 = arith.muli %c1_i32, %c8_i32_14 : i32
    %32 = tpu.assume_multiple %31, 8 : i32
    %33 = arith.index_cast %32 : i32 to index
    %c0_15 = arith.constant 0 : index
    %34 = vector.load %arg8[%33, %c0_15] : memref<64x128xf32, #tpu.memory_space<vmem>>, vector<8x128xf32>
    %c0_16 = arith.constant 0 : index
    %c0_17 = arith.constant 0 : index
    %35 = vector.load %arg3[%c0_16, %c0_17] : memref<32x128xf32, #tpu.memory_space<vmem>>, vector<32x128xf32>
    %cst_18 = arith.constant dense<0.000000e+00> : vector<8x128xf32>
    %36 = tpu.matmul %30, %35, %cst_18 {dimension_numbers = #tpu.dot_dimension_numbers<[1], [0], [0], [1], [0, 0, 1, 1], [], []>} : vector<8x32xf32>, vector<32x128xf32>, vector<8x128xf32> -> vector<8x128xf32>
    %37 = arith.addf %34, %36 : vector<8x128xf32>
    %38 = arith.negf %37 : vector<8x128xf32>
    %39 = math.exp %38 : vector<8x128xf32>
    %cst_19 = arith.constant 1.000000e+00 : f32
    %40 = vector.broadcast %cst_19 : f32 to vector<8x128xf32>
    %41 = arith.addf %40, %39 : vector<8x128xf32>
    %42 = arith.divf %40, %41 : vector<8x128xf32>
    %43 = math.tanh %37 : vector<8x128xf32>
    %44 = vector.extract_strided_slice %42 {offsets = [0, 0], sizes = [8, 32], strides = [1, 1]} : vector<8x128xf32> to vector<8x32xf32>
    %45 = vector.extract_strided_slice %42 {offsets = [0, 32], sizes = [8, 32], strides = [1, 1]} : vector<8x128xf32> to vector<8x32xf32>
    %46 = vector.extract_strided_slice %43 {offsets = [0, 64], sizes = [8, 32], strides = [1, 1]} : vector<8x128xf32> to vector<8x32xf32>
    %47 = vector.extract_strided_slice %42 {offsets = [0, 96], sizes = [8, 32], strides = [1, 1]} : vector<8x128xf32> to vector<8x32xf32>
    %48 = arith.mulf %45, %28 : vector<8x32xf32>
    %49 = arith.mulf %44, %46 : vector<8x32xf32>
    %50 = arith.addf %48, %49 : vector<8x32xf32>
    %51 = math.tanh %50 : vector<8x32xf32>
    %52 = arith.mulf %47, %51 : vector<8x32xf32>
    %c2_i32 = arith.constant 2 : i32
    %c8_i32_20 = arith.constant 8 : i32
    %53 = arith.muli %c2_i32, %c8_i32_20 : i32
    %54 = tpu.assume_multiple %53, 8 : i32
    %55 = arith.index_cast %54 : i32 to index
    %c0_21 = arith.constant 0 : index
    %56 = vector.load %arg8[%55, %c0_21] : memref<64x128xf32, #tpu.memory_space<vmem>>, vector<8x128xf32>
    %c0_22 = arith.constant 0 : index
    %c0_23 = arith.constant 0 : index
    %57 = vector.load %arg3[%c0_22, %c0_23] : memref<32x128xf32, #tpu.memory_space<vmem>>, vector<32x128xf32>
    %cst_24 = arith.constant dense<0.000000e+00> : vector<8x128xf32>
    %58 = tpu.matmul %52, %57, %cst_24 {dimension_numbers = #tpu.dot_dimension_numbers<[1], [0], [0], [1], [0, 0, 1, 1], [], []>} : vector<8x32xf32>, vector<32x128xf32>, vector<8x128xf32> -> vector<8x128xf32>
    %59 = arith.addf %56, %58 : vector<8x128xf32>
    %60 = arith.negf %59 : vector<8x128xf32>
    %61 = math.exp %60 : vector<8x128xf32>
    %cst_25 = arith.constant 1.000000e+00 : f32
    %62 = vector.broadcast %cst_25 : f32 to vector<8x128xf32>
    %63 = arith.addf %62, %61 : vector<8x128xf32>
    %64 = arith.divf %62, %63 : vector<8x128xf32>
    %65 = math.tanh %59 : vector<8x128xf32>
    %66 = vector.extract_strided_slice %64 {offsets = [0, 0], sizes = [8, 32], strides = [1, 1]} : vector<8x128xf32> to vector<8x32xf32>
    %67 = vector.extract_strided_slice %64 {offsets = [0, 32], sizes = [8, 32], strides = [1, 1]} : vector<8x128xf32> to vector<8x32xf32>
    %68 = vector.extract_strided_slice %65 {offsets = [0, 64], sizes = [8, 32], strides = [1, 1]} : vector<8x128xf32> to vector<8x32xf32>
    %69 = vector.extract_strided_slice %64 {offsets = [0, 96], sizes = [8, 32], strides = [1, 1]} : vector<8x128xf32> to vector<8x32xf32>
    %70 = arith.mulf %67, %50 : vector<8x32xf32>
    %71 = arith.mulf %66, %68 : vector<8x32xf32>
    %72 = arith.addf %70, %71 : vector<8x32xf32>
    %73 = math.tanh %72 : vector<8x32xf32>
    %74 = arith.mulf %69, %73 : vector<8x32xf32>
    %c3_i32 = arith.constant 3 : i32
    %c8_i32_26 = arith.constant 8 : i32
    %75 = arith.muli %c3_i32, %c8_i32_26 : i32
    %76 = tpu.assume_multiple %75, 8 : i32
    %77 = arith.index_cast %76 : i32 to index
    %c0_27 = arith.constant 0 : index
    %78 = vector.load %arg8[%77, %c0_27] : memref<64x128xf32, #tpu.memory_space<vmem>>, vector<8x128xf32>
    %c0_28 = arith.constant 0 : index
    %c0_29 = arith.constant 0 : index
    %79 = vector.load %arg3[%c0_28, %c0_29] : memref<32x128xf32, #tpu.memory_space<vmem>>, vector<32x128xf32>
    %cst_30 = arith.constant dense<0.000000e+00> : vector<8x128xf32>
    %80 = tpu.matmul %74, %79, %cst_30 {dimension_numbers = #tpu.dot_dimension_numbers<[1], [0], [0], [1], [0, 0, 1, 1], [], []>} : vector<8x32xf32>, vector<32x128xf32>, vector<8x128xf32> -> vector<8x128xf32>
    %81 = arith.addf %78, %80 : vector<8x128xf32>
    %82 = arith.negf %81 : vector<8x128xf32>
    %83 = math.exp %82 : vector<8x128xf32>
    %cst_31 = arith.constant 1.000000e+00 : f32
    %84 = vector.broadcast %cst_31 : f32 to vector<8x128xf32>
    %85 = arith.addf %84, %83 : vector<8x128xf32>
    %86 = arith.divf %84, %85 : vector<8x128xf32>
    %87 = math.tanh %81 : vector<8x128xf32>
    %88 = vector.extract_strided_slice %86 {offsets = [0, 0], sizes = [8, 32], strides = [1, 1]} : vector<8x128xf32> to vector<8x32xf32>
    %89 = vector.extract_strided_slice %86 {offsets = [0, 32], sizes = [8, 32], strides = [1, 1]} : vector<8x128xf32> to vector<8x32xf32>
    %90 = vector.extract_strided_slice %87 {offsets = [0, 64], sizes = [8, 32], strides = [1, 1]} : vector<8x128xf32> to vector<8x32xf32>
    %91 = vector.extract_strided_slice %86 {offsets = [0, 96], sizes = [8, 32], strides = [1, 1]} : vector<8x128xf32> to vector<8x32xf32>
    %92 = arith.mulf %89, %72 : vector<8x32xf32>
    %93 = arith.mulf %88, %90 : vector<8x32xf32>
    %94 = arith.addf %92, %93 : vector<8x32xf32>
    %95 = math.tanh %94 : vector<8x32xf32>
    %96 = arith.mulf %91, %95 : vector<8x32xf32>
    %c4_i32 = arith.constant 4 : i32
    %c8_i32_32 = arith.constant 8 : i32
    %97 = arith.muli %c4_i32, %c8_i32_32 : i32
    %98 = tpu.assume_multiple %97, 8 : i32
    %99 = arith.index_cast %98 : i32 to index
    %c0_33 = arith.constant 0 : index
    %100 = vector.load %arg8[%99, %c0_33] : memref<64x128xf32, #tpu.memory_space<vmem>>, vector<8x128xf32>
    %c0_34 = arith.constant 0 : index
    %c0_35 = arith.constant 0 : index
    %101 = vector.load %arg3[%c0_34, %c0_35] : memref<32x128xf32, #tpu.memory_space<vmem>>, vector<32x128xf32>
    %cst_36 = arith.constant dense<0.000000e+00> : vector<8x128xf32>
    %102 = tpu.matmul %96, %101, %cst_36 {dimension_numbers = #tpu.dot_dimension_numbers<[1], [0], [0], [1], [0, 0, 1, 1], [], []>} : vector<8x32xf32>, vector<32x128xf32>, vector<8x128xf32> -> vector<8x128xf32>
    %103 = arith.addf %100, %102 : vector<8x128xf32>
    %104 = arith.negf %103 : vector<8x128xf32>
    %105 = math.exp %104 : vector<8x128xf32>
    %cst_37 = arith.constant 1.000000e+00 : f32
    %106 = vector.broadcast %cst_37 : f32 to vector<8x128xf32>
    %107 = arith.addf %106, %105 : vector<8x128xf32>
    %108 = arith.divf %106, %107 : vector<8x128xf32>
    %109 = math.tanh %103 : vector<8x128xf32>
    %110 = vector.extract_strided_slice %108 {offsets = [0, 0], sizes = [8, 32], strides = [1, 1]} : vector<8x128xf32> to vector<8x32xf32>
    %111 = vector.extract_strided_slice %108 {offsets = [0, 32], sizes = [8, 32], strides = [1, 1]} : vector<8x128xf32> to vector<8x32xf32>
    %112 = vector.extract_strided_slice %109 {offsets = [0, 64], sizes = [8, 32], strides = [1, 1]} : vector<8x128xf32> to vector<8x32xf32>
    %113 = vector.extract_strided_slice %108 {offsets = [0, 96], sizes = [8, 32], strides = [1, 1]} : vector<8x128xf32> to vector<8x32xf32>
    %114 = arith.mulf %111, %94 : vector<8x32xf32>
    %115 = arith.mulf %110, %112 : vector<8x32xf32>
    %116 = arith.addf %114, %115 : vector<8x32xf32>
    %117 = math.tanh %116 : vector<8x32xf32>
    %118 = arith.mulf %113, %117 : vector<8x32xf32>
    %c5_i32 = arith.constant 5 : i32
    %c8_i32_38 = arith.constant 8 : i32
    %119 = arith.muli %c5_i32, %c8_i32_38 : i32
    %120 = tpu.assume_multiple %119, 8 : i32
    %121 = arith.index_cast %120 : i32 to index
    %c0_39 = arith.constant 0 : index
    %122 = vector.load %arg8[%121, %c0_39] : memref<64x128xf32, #tpu.memory_space<vmem>>, vector<8x128xf32>
    %c0_40 = arith.constant 0 : index
    %c0_41 = arith.constant 0 : index
    %123 = vector.load %arg3[%c0_40, %c0_41] : memref<32x128xf32, #tpu.memory_space<vmem>>, vector<32x128xf32>
    %cst_42 = arith.constant dense<0.000000e+00> : vector<8x128xf32>
    %124 = tpu.matmul %118, %123, %cst_42 {dimension_numbers = #tpu.dot_dimension_numbers<[1], [0], [0], [1], [0, 0, 1, 1], [], []>} : vector<8x32xf32>, vector<32x128xf32>, vector<8x128xf32> -> vector<8x128xf32>
    %125 = arith.addf %122, %124 : vector<8x128xf32>
    %126 = arith.negf %125 : vector<8x128xf32>
    %127 = math.exp %126 : vector<8x128xf32>
    %cst_43 = arith.constant 1.000000e+00 : f32
    %128 = vector.broadcast %cst_43 : f32 to vector<8x128xf32>
    %129 = arith.addf %128, %127 : vector<8x128xf32>
    %130 = arith.divf %128, %129 : vector<8x128xf32>
    %131 = math.tanh %125 : vector<8x128xf32>
    %132 = vector.extract_strided_slice %130 {offsets = [0, 0], sizes = [8, 32], strides = [1, 1]} : vector<8x128xf32> to vector<8x32xf32>
    %133 = vector.extract_strided_slice %130 {offsets = [0, 32], sizes = [8, 32], strides = [1, 1]} : vector<8x128xf32> to vector<8x32xf32>
    %134 = vector.extract_strided_slice %131 {offsets = [0, 64], sizes = [8, 32], strides = [1, 1]} : vector<8x128xf32> to vector<8x32xf32>
    %135 = vector.extract_strided_slice %130 {offsets = [0, 96], sizes = [8, 32], strides = [1, 1]} : vector<8x128xf32> to vector<8x32xf32>
    %136 = arith.mulf %133, %116 : vector<8x32xf32>
    %137 = arith.mulf %132, %134 : vector<8x32xf32>
    %138 = arith.addf %136, %137 : vector<8x32xf32>
    %139 = math.tanh %138 : vector<8x32xf32>
    %140 = arith.mulf %135, %139 : vector<8x32xf32>
    %c6_i32 = arith.constant 6 : i32
    %c8_i32_44 = arith.constant 8 : i32
    %141 = arith.muli %c6_i32, %c8_i32_44 : i32
    %142 = tpu.assume_multiple %141, 8 : i32
    %143 = arith.index_cast %142 : i32 to index
    %c0_45 = arith.constant 0 : index
    %144 = vector.load %arg8[%143, %c0_45] : memref<64x128xf32, #tpu.memory_space<vmem>>, vector<8x128xf32>
    %c0_46 = arith.constant 0 : index
    %c0_47 = arith.constant 0 : index
    %145 = vector.load %arg3[%c0_46, %c0_47] : memref<32x128xf32, #tpu.memory_space<vmem>>, vector<32x128xf32>
    %cst_48 = arith.constant dense<0.000000e+00> : vector<8x128xf32>
    %146 = tpu.matmul %140, %145, %cst_48 {dimension_numbers = #tpu.dot_dimension_numbers<[1], [0], [0], [1], [0, 0, 1, 1], [], []>} : vector<8x32xf32>, vector<32x128xf32>, vector<8x128xf32> -> vector<8x128xf32>
    %147 = arith.addf %144, %146 : vector<8x128xf32>
    %148 = arith.negf %147 : vector<8x128xf32>
    %149 = math.exp %148 : vector<8x128xf32>
    %cst_49 = arith.constant 1.000000e+00 : f32
    %150 = vector.broadcast %cst_49 : f32 to vector<8x128xf32>
    %151 = arith.addf %150, %149 : vector<8x128xf32>
    %152 = arith.divf %150, %151 : vector<8x128xf32>
    %153 = math.tanh %147 : vector<8x128xf32>
    %154 = vector.extract_strided_slice %152 {offsets = [0, 0], sizes = [8, 32], strides = [1, 1]} : vector<8x128xf32> to vector<8x32xf32>
    %155 = vector.extract_strided_slice %152 {offsets = [0, 32], sizes = [8, 32], strides = [1, 1]} : vector<8x128xf32> to vector<8x32xf32>
    %156 = vector.extract_strided_slice %153 {offsets = [0, 64], sizes = [8, 32], strides = [1, 1]} : vector<8x128xf32> to vector<8x32xf32>
    %157 = vector.extract_strided_slice %152 {offsets = [0, 96], sizes = [8, 32], strides = [1, 1]} : vector<8x128xf32> to vector<8x32xf32>
    %158 = arith.mulf %155, %138 : vector<8x32xf32>
    %159 = arith.mulf %154, %156 : vector<8x32xf32>
    %160 = arith.addf %158, %159 : vector<8x32xf32>
    %161 = math.tanh %160 : vector<8x32xf32>
    %162 = arith.mulf %157, %161 : vector<8x32xf32>
    %c7_i32 = arith.constant 7 : i32
    %c8_i32_50 = arith.constant 8 : i32
    %163 = arith.muli %c7_i32, %c8_i32_50 : i32
    %164 = tpu.assume_multiple %163, 8 : i32
    %165 = arith.index_cast %164 : i32 to index
    %c0_51 = arith.constant 0 : index
    %166 = vector.load %arg8[%165, %c0_51] : memref<64x128xf32, #tpu.memory_space<vmem>>, vector<8x128xf32>
    %c0_52 = arith.constant 0 : index
    %c0_53 = arith.constant 0 : index
    %167 = vector.load %arg3[%c0_52, %c0_53] : memref<32x128xf32, #tpu.memory_space<vmem>>, vector<32x128xf32>
    %cst_54 = arith.constant dense<0.000000e+00> : vector<8x128xf32>
    %168 = tpu.matmul %162, %167, %cst_54 {dimension_numbers = #tpu.dot_dimension_numbers<[1], [0], [0], [1], [0, 0, 1, 1], [], []>} : vector<8x32xf32>, vector<32x128xf32>, vector<8x128xf32> -> vector<8x128xf32>
    %169 = arith.addf %166, %168 : vector<8x128xf32>
    %170 = arith.negf %169 : vector<8x128xf32>
    %171 = math.exp %170 : vector<8x128xf32>
    %cst_55 = arith.constant 1.000000e+00 : f32
    %172 = vector.broadcast %cst_55 : f32 to vector<8x128xf32>
    %173 = arith.addf %172, %171 : vector<8x128xf32>
    %174 = arith.divf %172, %173 : vector<8x128xf32>
    %175 = math.tanh %169 : vector<8x128xf32>
    %176 = vector.extract_strided_slice %174 {offsets = [0, 0], sizes = [8, 32], strides = [1, 1]} : vector<8x128xf32> to vector<8x32xf32>
    %177 = vector.extract_strided_slice %174 {offsets = [0, 32], sizes = [8, 32], strides = [1, 1]} : vector<8x128xf32> to vector<8x32xf32>
    %178 = vector.extract_strided_slice %175 {offsets = [0, 64], sizes = [8, 32], strides = [1, 1]} : vector<8x128xf32> to vector<8x32xf32>
    %179 = vector.extract_strided_slice %174 {offsets = [0, 96], sizes = [8, 32], strides = [1, 1]} : vector<8x128xf32> to vector<8x32xf32>
    %180 = arith.mulf %177, %160 : vector<8x32xf32>
    %181 = arith.mulf %176, %178 : vector<8x32xf32>
    %182 = arith.addf %180, %181 : vector<8x32xf32>
    %183 = math.tanh %182 : vector<8x32xf32>
    %184 = arith.mulf %179, %183 : vector<8x32xf32>
    %c8_i32_56 = arith.constant 8 : i32
    %c0_57 = arith.constant 0 : index
    %c0_58 = arith.constant 0 : index
    %185 = vector.load %arg5[%c0_57, %c0_58] : memref<32x16xf32, #tpu.memory_space<vmem>>, vector<32x16xf32>
    %cst_59 = arith.constant dense<0.000000e+00> : vector<8x16xf32>
    %186 = tpu.matmul %184, %185, %cst_59 {dimension_numbers = #tpu.dot_dimension_numbers<[1], [0], [0], [1], [0, 0, 1, 1], [], []>} : vector<8x32xf32>, vector<32x16xf32>, vector<8x16xf32> -> vector<8x16xf32>
    %c0_60 = arith.constant 0 : index
    %c0_61 = arith.constant 0 : index
    %187 = vector.load %arg6[%c0_60, %c0_61] : memref<1x16xf32, #tpu.memory_space<vmem>>, vector<1x16xf32>
    %188 = vector.broadcast %187 : vector<1x16xf32> to vector<8x16xf32>
    %189 = arith.addf %186, %188 : vector<8x16xf32>
    %c0_62 = arith.constant 0 : index
    %c0_63 = arith.constant 0 : index
    %190 = vector.load %arg7[%c0_62, %c0_63] : memref<8x16xf32, #tpu.memory_space<vmem>>, vector<8x16xf32>
    tpu.vector_store %arg7[%c0_62, %c0_63], %189 {strides = array<i32>} : memref<8x16xf32, #tpu.memory_space<vmem>>, vector<8x16xf32>,
    return
  }
  func.func @transform_0(%arg0: i32) -> (i32, i32) {
    %c0_i32 = arith.constant 0 : i32
    %c0_i32_0 = arith.constant 0 : i32
    %c0_i32_1 = arith.constant 0 : i32
    return %c0_i32, %c0_i32_0 : i32, i32
  }
  func.func @transform_1(%arg0: i32) -> (i32, i32) {
    %c0_i32 = arith.constant 0 : i32
    %c0_i32_0 = arith.constant 0 : i32
    %c0_i32_1 = arith.constant 0 : i32
    return %c0_i32, %c0_i32_0 : i32, i32
  }
  func.func @transform_2(%arg0: i32) -> (i32, i32) {
    %c0_i32 = arith.constant 0 : i32
    %c0_i32_0 = arith.constant 0 : i32
    %c0_i32_1 = arith.constant 0 : i32
    return %c0_i32, %c0_i32_0 : i32, i32
  }
  func.func @transform_3(%arg0: i32) -> (i32, i32) {
    %c0_i32 = arith.constant 0 : i32
    %c0_i32_0 = arith.constant 0 : i32
    %c0_i32_1 = arith.constant 0 : i32
    return %c0_i32, %c0_i32_0 : i32, i32
  }
  func.func @transform_4(%arg0: i32) -> (i32, i32) {
    %c0_i32 = arith.constant 0 : i32
    %c0_i32_0 = arith.constant 0 : i32
    %c0_i32_1 = arith.constant 0 : i32
    return %c0_i32, %c0_i32_0 : i32, i32
  }
  func.func @transform_5(%arg0: i32) -> (i32, i32) {
    %c0_i32 = arith.constant 0 : i32
    %c0_i32_0 = arith.constant 0 : i32
    %c0_i32_1 = arith.constant 0 : i32
    return %c0_i32, %c0_i32_0 : i32, i32
  }
  func.func @transform_6(%arg0: i32) -> (i32, i32) {
    %c0_i32 = arith.constant 0 : i32
    %c0_i32_0 = arith.constant 0 : i32
    %c0_i32_1 = arith.constant 0 : i32
    return %c0_i32, %c0_i32_0 : i32, i32
  }
}

</mosaic_0001>

<bundles_post_ra>
// kernel: tpu_custom_call.1
= control target key start
LH: loop header
LB: loop body
LE: loop exit
PB: predicated region body
PF: predicated region fallthrough
CT: control target
= control target key end

     0   :  { %vm43_vm0 = vcmask 261120   ;;  %v1458_v4 = vmov 0.0|0.0   ;;  %vm1459_vm1 = vmmov 0   ;;  %v1460_v13 = vmov 0.0   ;;  %s1704_s0 = inlined_call_operand.vmem [shape: f32[64,32], index: 0, kind: input, shape index: {}]   ;;  %s1705_s1 = inlined_call_operand.vmem [shape: f32[32,128], index: 1, kind: input, shape index: {}]   ;;  %s1706_s2 = inlined_call_operand.vmem [shape: f32[32,128], index: 2, kind: input, shape index: {}]   ;;  %s1707_s3 = inlined_call_operand.vmem [shape: f32[1,128], index: 3, kind: input, shape index: {}]   ;;  %s1708_s4 = inlined_call_operand.vmem [shape: f32[32,16], index: 4, kind: input, shape index: {}]   ;;  %s1709_s5 = inlined_call_operand.vmem [shape: f32[1,16], index: 5, kind: input, shape index: {}]   ;;  %s1710_s6 = inlined_call_operand.hbm [shape: f32[8,16], index: 6, kind: output, shape index: {}]  }
   0x1   :  { %v32_v0 = vld [vmem:[%s1705_s1] sm:$0xff]  ;;  %v33_v1 = vld [vmem:[%s1705_s1 + $0x8] sm:$0xff]  ;;  %1310 = vmatprep.subr.bf16.mxu1 %v1458_v4  ;;  %v34_v6 = vld [vmem:[%s1705_s1 + $0x10] sm:$0xff]  ;;  %1211 = vmatprep.mubr.msk.f32.mxu1 %vm1459_vm1, %v1460_v13 }
   0x2   :  { %v182_v2 = vld [vmem:[%s1706_s2] sm:$0xff]  ;;  %v1302_v3 = vpack.c.bf16 %v33_v1, %v32_v0  ;;  %v183_v5 = vld [vmem:[%s1706_s2 + $0x8] sm:$0xff]  ;;  %v35_v7 = vld [vmem:[%s1705_s1 + $0x18] sm:$0xff] }
   0x3   :  { %v1518_v8 = vpack.c.bf16 %v183_v5, %v182_v2  ;;  %v1306_v9 = vpack.c.bf16 %v35_v7, %v34_v6  ;;  %v24_v10 = vld [vmem:[%s1704_s0] sm:$0xff]  ;;  %v184_v11 = vld [vmem:[%s1706_s2 + $0x10] sm:$0xff]  ;;  %v185_v12 = vld [vmem:[%s1706_s2 + $0x18] sm:$0xff] }
   0x4   :  { %1303 = vmatprep.subr.bf16.mxu0 %v1302_v3  ;;  %1191 = vmatprep.mubr.msk.f32.mxu0 %vm43_vm0, %v24_v10 }
   0x5   :  { %11 = vsyncpa [#allocation4], 0  ;;  %1305 = vmatpush3.bf16.msra.mxu0 %v1302_v3  ;;  %1312 = vmatpush3.bf16.msra.mxu1 %v1518_v8  ;;  %v1533_v14 = vpack.c.bf16 %v185_v12, %v184_v11  ;;  %v25_v15 = vld [vmem:[%s1704_s0 + $0x8] sm:$0xff]  ;;  %v1557_v16 = vld [vmem:[%s1707_s3] ss:$0 sm:$0xff]  ;;  %s1461_s17 = smov 64  }
   0x6   :  { %1307 = vmatprep.subr.bf16.mxu0 %v1306_v9  ;;  %1313 = vmatprep.subr.bf16.mxu1 %v1458_v4  ;;  %s1462_s3 = smov 32   ;;  %v26_v51 = vld [vmem:[%s1704_s0 + $0x10] sm:$0xff]  ;;  %v27_v52 = vld [vmem:[%s1704_s0 + $0x18] sm:$0xff]  ;;  %v28_v53 = vld [vmem:[%s1704_s0 + $0x20] sm:$0xff]  ;;  %vm1084_vm2 = vcmask 130048  }
   0x7   :  { %v29_v54 = vld [vmem:[%s1704_s0 + $0x28] sm:$0xff]  ;;  %v30_v55 = vld [vmem:[%s1704_s0 + $0x30] sm:$0xff]  ;;  %v31_v56 = vld [vmem:[%s1704_s0 + $0x38] sm:$0xff] }
   0x9   :  { %1309 = vmatpush3.bf16.msra.mxu0 %v1306_v9  ;;  %1315 = vmatpush3.bf16.msra.mxu1 %v1533_v14 }
   0xa   :  { %1316 = vmatprep.subr.bf16.mxu1 %v1458_v4  ;;  %1322 = vmatprep.subr.bf16.mxu0 %v1458_v4 }
   0xc   :  { %1192 = vmatmul.mubr.msk.f32.vlgmr.msra.gmra.mrb[0].mxu0 %vm43_vm0, %v25_v15  ;;  %1212 = vmatmul.mubr.f32.vlgmr.msra.gmra.mrb[0].mxu1 %v1460_v13 }
   0xd   :  { %1318 = vmatpush3.bf16.msra.mxu1 %v1518_v8  ;;  %1222 = vmatprep.mubr.msk.f32.mxu1 %vm1459_vm1, %v1460_v13 }
   0xe   :  { %1319 = vmatprep.subr.bf16.mxu1 %v1458_v4  ;;  %1324 = vmatpush3.bf16.msra.mxu0 %v1518_v8 }
   0xf   :  { %1325 = vmatprep.subr.bf16.mxu0 %v1458_v4  ;;  %1194 = vmatprep.mubr.msk.f32.mxu0 %vm43_vm0, %v26_v51 }
  0x10   :  { %1195 = vmatmul.mubr.msk.f32.gmra.mrb[2].mxu0 %vm43_vm0, %v27_v52 }
  0x11   :  { %1321 = vmatpush3.bf16.msra.mxu1 %v1533_v14  ;;  %1197 = vmatprep.mubr.msk.f32.mxu0 %vm43_vm0, %v28_v53 }
  0x12   :  { %1327 = vmatpush3.bf16.msra.mxu0 %v1533_v14  ;;  %1328 = vmatprep.subr.bf16.mxu1 %v1458_v4 }
  0x13   :  { %1334 = vmatprep.subr.bf16.mxu0 %v1458_v4 }
  0x14   :  { %1198 = vmatmul.mubr.msk.f32.gmra.mrb[4].mxu0 %vm43_vm0, %v29_v54 }
  0x15   :  { %1200 = vmatprep.mubr.msk.f32.mxu0 %vm43_vm0, %v30_v55 }
  0x18   :  { %1201 = vmatmul.mubr.msk.f32.gmra.mrb[6].mxu0 %vm43_vm0, %v31_v56 }
  0x19   :  { %1233 = vmatprep.mubr.msk.f32.mxu0 %vm1459_vm1, %v1460_v13 }
  0xdf   :  { %v1193_v17 = vpop.f32.mrb[0].mxu0  ;;  %v255_v18 = vpop.f32.mrb[0].mxu1 }
  0xe0   :  { %v134_v19 = vpop.f32.mrb[1].mxu0  ;;  %v1213_v20 = vpop.f32.mrb[1].mxu1  ;;  %v140_v37 = vadd.f32 %v1193_v17, %v1557_v16 }
  0xe1   :  { %v135_v21 = vadd.f32 %v1557_v16, %v134_v19 }
  0xe3   :  { %v259_v22 = vadd.f32 %v255_v18, %v135_v21  ;;  %v1196_v60 = vpop.f32.mrb[2].mxu0 }
  0xe4   :  { %v144_v61 = vpop.f32.mrb[3].mxu0 }
  0xe5   :  { %1370 = vtanh.f32 %v259_v22  ;;  %v1109_v24 = vmul.f32 -1.442695, %v259_v22  ;;  %v145_v3 = vadd.f32 %v1557_v16, %v144_v61 }
  0xe7   :  { %1372 = vpow2.f32 %v1109_v24  ;;  %v1602_v62 = vpop.f32.mrb[4].mxu0 }
  0xe8   :  { %v1604_v63 = vpop.f32.mrb[5].mxu0 }
  0xeb   :  { %v1606_v0 = vpop.f32.mrb[6].mxu0 }
  0xec   :  { %v1608_v1 = vpop.f32.mrb[7].mxu0 }
  0xef   :  { %v1371_v23 = vpop.eup %1370 }
  0xf0   :  { %269 = vrot.lane.b32.xlu0 %v1371_v23, %s1461_s17 }
  0xf1   :  { %v1373_v25 = vpop.eup %1372 }
  0xf2   :  { %v263_v26 = vadd.f32 1.0, %v1373_v25 }
  0xf4   :  { %1374 = vrcp.f32 %v263_v26  ;;  %v150_v26 = vadd.f32 %v1196_v60, %v1557_v16 }
  0xfe   :  { %v1375_v27 = vpop.eup %1374 }
  0xff   :  { %v267_v30 = vmul.f32 0.0, %v1375_v27 }
 0x162   :  { %v270_v28 = vpop.permute.xlu0 %269 }
 0x163   :  { %v272_v29 = vmul.f32 %v1375_v27, %v270_v28 }
 0x165   :  { %274 = vrot.lane.b32.xlu0 %v272_v29, %s1462_s3 }
 0x1d7   :  { %v275_v31 = vpop.permute.xlu0 %274 }
 0x1d8   :  { %v277_v32 = vadd.f32 %v275_v31, %v267_v30 }
 0x1da   :  { %1376 = vtanh.f32 %v277_v32 }
 0x1e4   :  { %v1377_v33 = vpop.eup %1376 }
 0x1e5   :  { %280 = vrot.lane.b32.xlu1 %v1377_v33, %s1461_s17 }
 0x257   :  { %v281_v34 = vpop.permute.xlu1 %280 }
 0x258   :  { %v283_v35 = vmul.f32 %v1375_v27, %v281_v34 }
 0x25a   :  { %287 = vrot.lane.b32.xlu1 %v283_v35, %s1462_s3 }
 0x2cc   :  { %v288_v36 = vpop.permute.xlu1 %287 }
 0x2cd   :  { %1223 = vmatmul.mubr.msk.f32.vlgmr.msra.gmra.mrb[2].mxu1 %vm43_vm0, %v288_v36 }
 0x2ce   :  { %1330 = vmatpush3.bf16.msra.mxu1 %v1518_v8  ;;  %1244 = vmatprep.mubr.msk.f32.mxu1 %vm1459_vm1, %v1460_v13 }
 0x2cf   :  { %1331 = vmatprep.subr.bf16.mxu1 %v1458_v4 }
 0x2d2   :  { %1333 = vmatpush3.bf16.msra.mxu1 %v1533_v14 }
 0x2d3   :  { %1340 = vmatprep.subr.bf16.mxu1 %v1458_v4 }
 0x3a0   :  { %v357_v38 = vpop.f32.mrb[2].mxu1 }
 0x3a1   :  { %v361_v39 = vadd.f32 %v357_v38, %v140_v37  ;;  %v1224_v40 = vpop.f32.mrb[3].mxu1 }
 0x3a3   :  { %1378 = vtanh.f32 %v361_v39  ;;  %v1111_v42 = vmul.f32 -1.442695, %v361_v39 }
 0x3a5   :  { %1380 = vpow2.f32 %v1111_v42 }
 0x3ad   :  { %v1379_v41 = vpop.eup %1378 }
 0x3ae   :  { %371 = vrot.lane.b32.xlu0 %v1379_v41, %s1461_s17 }
 0x3af   :  { %v1381_v43 = vpop.eup %1380 }
 0x3b0   :  { %v365_v44 = vadd.f32 1.0, %v1381_v43 }
 0x3b2   :  { %1382 = vrcp.f32 %v365_v44  ;;  %v155_v44 = vadd.f32 %v1557_v16, %v1604_v63  ;;  %v160_v63 = vadd.f32 %v1602_v62, %v1557_v16 }
 0x3bc   :  { %v1383_v45 = vpop.eup %1382 }
 0x3bd   :  { %v369_v48 = vmul.f32 %v1383_v45, %v277_v32 }
 0x420   :  { %v372_v46 = vpop.permute.xlu0 %371 }
 0x421   :  { %v374_v47 = vmul.f32 %v1383_v45, %v372_v46 }
 0x423   :  { %376 = vrot.lane.b32.xlu1 %v374_v47, %s1462_s3 }
 0x495   :  { %v377_v49 = vpop.permute.xlu1 %376 }
 0x496   :  { %v379_v50 = vadd.f32 %v377_v49, %v369_v48 }
 0x498   :  { %1384 = vtanh.f32 %v379_v50 }
 0x4a2   :  { %v1385_v57 = vpop.eup %1384 }
 0x4a3   :  { %382 = vrot.lane.b32.xlu0 %v1385_v57, %s1461_s17 }
 0x515   :  { %v383_v58 = vpop.permute.xlu0 %382 }
 0x516   :  { %v385_v59 = vmul.f32 %v1383_v45, %v383_v58 }
 0x518   :  { %389 = vrot.lane.b32.xlu1 %v385_v59, %s1462_s3 }
 0x58a   :  { %v390_v2 = vpop.permute.xlu1 %389 }
 0x58b   :  { %1234 = vmatmul.mubr.msk.f32.vlgmr.msra.gmra.mrb[8].mxu0 %vm43_vm0, %v390_v2 }
 0x58c   :  { %1336 = vmatpush3.bf16.msra.mxu0 %v1518_v8  ;;  %1255 = vmatprep.mubr.msk.f32.mxu0 %vm1459_vm1, %v1460_v13 }
 0x58d   :  { %1337 = vmatprep.subr.bf16.mxu0 %v1458_v4 }
 0x590   :  { %1339 = vmatpush3.bf16.msra.mxu0 %v1533_v14 }
 0x591   :  { %1346 = vmatprep.subr.bf16.mxu0 %v1458_v4 }
 0x65e   :  { %v459_v5 = vpop.f32.mrb[8].mxu0 }
 0x65f   :  { %v463_v6 = vadd.f32 %v459_v5, %v145_v3  ;;  %v1235_v7 = vpop.f32.mrb[9].mxu0 }
 0x661   :  { %1386 = vtanh.f32 %v463_v6  ;;  %v1113_v10 = vmul.f32 -1.442695, %v463_v6 }
 0x663   :  { %1388 = vpow2.f32 %v1113_v10 }
 0x66b   :  { %v1387_v9 = vpop.eup %1386 }
 0x66c   :  { %473 = vrot.lane.b32.xlu0 %v1387_v9, %s1461_s17 }
 0x66d   :  { %v1389_v11 = vpop.eup %1388 }
 0x66e   :  { %v467_v12 = vadd.f32 1.0, %v1389_v11 }
 0x670   :  { %1390 = vrcp.f32 %v467_v12 }
 0x67a   :  { %v1391_v15 = vpop.eup %1390 }
 0x67b   :  { %v471_v19 = vmul.f32 %v1391_v15, %v379_v50 }
 0x6de   :  { %v474_v17 = vpop.permute.xlu0 %473 }
 0x6df   :  { %v476_v18 = vmul.f32 %v1391_v15, %v474_v17 }
 0x6e1   :  { %478 = vrot.lane.b32.xlu1 %v476_v18, %s1462_s3 }
 0x753   :  { %v479_v20 = vpop.permute.xlu1 %478 }
 0x754   :  { %v481_v21 = vadd.f32 %v479_v20, %v471_v19 }
 0x756   :  { %1392 = vtanh.f32 %v481_v21 }
 0x760   :  { %v1393_v22 = vpop.eup %1392 }
 0x761   :  { %484 = vrot.lane.b32.xlu0 %v1393_v22, %s1461_s17 }
 0x7d3   :  { %v485_v23 = vpop.permute.xlu0 %484 }
 0x7d4   :  { %v487_v24 = vmul.f32 %v1391_v15, %v485_v23 }
 0x7d6   :  { %491 = vrot.lane.b32.xlu1 %v487_v24, %s1462_s3 }
 0x848   :  { %v492_v25 = vpop.permute.xlu1 %491 }
 0x849   :  { %1245 = vmatmul.mubr.msk.f32.vlgmr.msra.gmra.mrb[4].mxu1 %vm43_vm0, %v492_v25 }
 0x84a   :  { %1342 = vmatpush3.bf16.msra.mxu1 %v1518_v8  ;;  %1266 = vmatprep.mubr.msk.f32.mxu1 %vm1459_vm1, %v1460_v13 }
 0x84b   :  { %1343 = vmatprep.subr.bf16.mxu1 %v1458_v4 }
 0x84e   :  { %1345 = vmatpush3.bf16.msra.mxu1 %v1533_v14 }
 0x84f   :  { %1352 = vmatprep.subr.bf16.mxu1 %v1458_v4 }
 0x91c   :  { %v561_v27 = vpop.f32.mrb[4].mxu1 }
 0x91d   :  { %v565_v28 = vadd.f32 %v561_v27, %v150_v26  ;;  %v1246_v29 = vpop.f32.mrb[5].mxu1 }
 0x91f   :  { %1394 = vtanh.f32 %v565_v28  ;;  %v1115_v31 = vmul.f32 -1.442695, %v565_v28 }
 0x921   :  { %1396 = vpow2.f32 %v1115_v31 }
 0x929   :  { %v1395_v30 = vpop.eup %1394 }
 0x92a   :  { %575 = vrot.lane.b32.xlu0 %v1395_v30, %s1461_s17 }
 0x92b   :  { %v1397_v32 = vpop.eup %1396 }
 0x92c   :  { %v569_v33 = vadd.f32 1.0, %v1397_v32 }
 0x92e   :  { %1398 = vrcp.f32 %v569_v33 }
 0x938   :  { %v1399_v34 = vpop.eup %1398 }
 0x939   :  { %v573_v37 = vmul.f32 %v1399_v34, %v481_v21  ;;  %v165_v21 = vadd.f32 %v1557_v16, %v1608_v1 }
 0x99c   :  { %v576_v35 = vpop.permute.xlu0 %575 }
 0x99d   :  { %v578_v36 = vmul.f32 %v1399_v34, %v576_v35 }
 0x99f   :  { %580 = vrot.lane.b32.xlu1 %v578_v36, %s1462_s3 }
 0xa11   :  { %v581_v38 = vpop.permute.xlu1 %580 }
 0xa12   :  { %v583_v39 = vadd.f32 %v581_v38, %v573_v37  ;;  %v170_v37 = vadd.f32 %v1606_v0, %v1557_v16  ;;  %v998_v0 = vld [vmem:[%s1708_s4] sm:$0xff] }
 0xa14   :  { %1400 = vtanh.f32 %v583_v39 }
 0xa1e   :  { %v1401_v40 = vpop.eup %1400 }
 0xa1f   :  { %586 = vrot.lane.b32.xlu0 %v1401_v40, %s1461_s17 }
 0xa91   :  { %v587_v41 = vpop.permute.xlu0 %586 }
 0xa92   :  { %v589_v42 = vmul.f32 %v1399_v34, %v587_v41 }
 0xa94   :  { %593 = vrot.lane.b32.xlu1 %v589_v42, %s1462_s3 }
 0xb06   :  { %v594_v43 = vpop.permute.xlu1 %593 }
 0xb07   :  { %1256 = vmatmul.mubr.msk.f32.vlgmr.msra.gmra.mrb[10].mxu0 %vm43_vm0, %v594_v43 }
 0xb08   :  { %1348 = vmatpush3.bf16.msra.mxu0 %v1518_v8  ;;  %1277 = vmatprep.mubr.msk.f32.mxu0 %vm1459_vm1, %v1460_v13 }
 0xb09   :  { %1349 = vmatprep.subr.bf16.mxu0 %v1458_v4 }
 0xb0c   :  { %1351 = vmatpush3.bf16.msra.mxu0 %v1533_v14 }
 0xb0d   :  { %1358 = vmatprep.subr.bf16.mxu0 %v1458_v4 }
 0xbda   :  { %v663_v45 = vpop.f32.mrb[10].mxu0 }
 0xbdb   :  { %v667_v46 = vadd.f32 %v663_v45, %v155_v44  ;;  %v1257_v47 = vpop.f32.mrb[11].mxu0 }
 0xbdd   :  { %1402 = vtanh.f32 %v667_v46  ;;  %v1117_v49 = vmul.f32 -1.442695, %v667_v46 }
 0xbdf   :  { %1404 = vpow2.f32 %v1117_v49 }
 0xbe7   :  { %v1403_v48 = vpop.eup %1402 }
 0xbe8   :  { %677 = vrot.lane.b32.xlu0 %v1403_v48, %s1461_s17 }
 0xbe9   :  { %v1405_v50 = vpop.eup %1404 }
 0xbea   :  { %v671_v51 = vadd.f32 1.0, %v1405_v50  ;;  %v999_v50 = vld [vmem:[%s1708_s4 + $0x8] sm:$0xff] }
 0xbec   :  { %1406 = vrcp.f32 %v671_v51  ;;  %v1000_v51 = vld [vmem:[%s1708_s4 + $0x10] sm:$0xff] }
 0xbf6   :  { %v1407_v52 = vpop.eup %1406 }
 0xbf7   :  { %v675_v55 = vmul.f32 %v1407_v52, %v583_v39 }
 0xc5a   :  { %v678_v53 = vpop.permute.xlu0 %677 }
 0xc5b   :  { %v680_v54 = vmul.f32 %v1407_v52, %v678_v53  ;;  %v1001_v53 = vld [vmem:[%s1708_s4 + $0x18] sm:$0xff]  ;;  %s1463_s4 = smov [#allocation3]  }
 0xc5c   :  { %s1092_s1 = sshll.u32 %s1463_s4, 4  ;;  %s1093_s1 = int_to_ptr.vmem [resolvable:$true] %s1092_s1 }
 0xc5d   :  { %682 = vrot.lane.b32.xlu1 %v680_v54, %s1462_s3  ;;  %v1362_v54 = vpack.c.bf16 %v1001_v53, %v1000_v51  ;;  %s1434_s2 = scalar_lea.vmem %s1093_s1, 128  ;;  %p1439_p1 = scmp.lt.s32.totalorder %s1093_s1, %s1093_s1 }
 0xc5e   :  { %p1435_p0 = scmp.ne.s32.totalorder %s1093_s1, %s1434_s2  ;;  %p1440_p2 = scmp.lt.s32.totalorder %s1434_s2, %s1434_s2 }
 0xc60   :  { %p1441_p3 = por %p1440_p2, %p1439_p1 }
 0xc62   :  { %p1442_p4 = pnand %p1441_p3, %p1435_p0 }
 0xccf   :  { %v683_v56 = vpop.permute.xlu1 %682 }
 0xcd0   :  { %v685_v57 = vadd.f32 %v683_v56, %v675_v55 }
 0xcd2   :  { %1408 = vtanh.f32 %v685_v57 }
 0xcdc   :  { %v1409_v58 = vpop.eup %1408 }
 0xcdd   :  { %688 = vrot.lane.b32.xlu0 %v1409_v58, %s1461_s17 }
 0xd4f   :  { %v689_v59 = vpop.permute.xlu0 %688 }
 0xd50   :  { %v691_v60 = vmul.f32 %v1407_v52, %v689_v59  ;;  %v1359_v52 = vpack.c.bf16 %v999_v50, %v998_v0  ;;  %v1124_v59 = vld [vmem:[%s1709_s5] ss:$0 sm:$0xff] }
 0xd52   :  { %695 = vrot.lane.b32.xlu1 %v691_v60, %s1462_s3 }
 0xdc4   :  { %v696_v61 = vpop.permute.xlu1 %695 }
 0xdc5   :  { %1267 = vmatmul.mubr.msk.f32.vlgmr.msra.gmra.mrb[6].mxu1 %vm43_vm0, %v696_v61 }
 0xdc6   :  { %1354 = vmatpush3.bf16.msra.mxu1 %v1518_v8  ;;  %1288 = vmatprep.mubr.msk.f32.mxu1 %vm1459_vm1, %v1460_v13 }
 0xdc7   :  { %1355 = vmatprep.subr.bf16.mxu1 %v1458_v4 }
 0xdca   :  { %1357 = vmatpush3.bf16.msra.mxu1 %v1533_v14 }
 0xe98   :  { %v765_v2 = vpop.f32.mrb[6].mxu1 }
 0xe99   :  { %v769_v3 = vadd.f32 %v765_v2, %v160_v63  ;;  %v1268_v5 = vpop.f32.mrb[7].mxu1 }
 0xe9b   :  { %1410 = vtanh.f32 %v769_v3  ;;  %v1119_v7 = vmul.f32 -1.442695, %v769_v3 }
 0xe9d   :  { %1412 = vpow2.f32 %v1119_v7 }
 0xea5   :  { %v1411_v6 = vpop.eup %1410 }
 0xea6   :  { %779 = vrot.lane.b32.xlu0 %v1411_v6, %s1461_s17 }
 0xea7   :  { %v1413_v8 = vpop.eup %1412 }
 0xea8   :  { %v773_v9 = vadd.f32 1.0, %v1413_v8 }
 0xeaa   :  { %1414 = vrcp.f32 %v773_v9 }
 0xeb4   :  { %v1415_v10 = vpop.eup %1414 }
 0xeb5   :  { %v777_v14 = vmul.f32 %v1415_v10, %v685_v57 }
 0xf18   :  { %v780_v11 = vpop.permute.xlu0 %779 }
 0xf19   :  { %v782_v12 = vmul.f32 %v1415_v10, %v780_v11 }
 0xf1b   :  { %784 = vrot.lane.b32.xlu1 %v782_v12, %s1462_s3 }
 0xf8d   :  { %v785_v15 = vpop.permute.xlu1 %784 }
 0xf8e   :  { %v787_v62 = vadd.f32 %v785_v15, %v777_v14 }
 0xf90   :  { %1416 = vtanh.f32 %v787_v62 }
 0xf9a   :  { %v1417_v17 = vpop.eup %1416 }
 0xf9b   :  { %790 = vrot.lane.b32.xlu0 %v1417_v17, %s1461_s17 }
0x100d   :  { %v791_v18 = vpop.permute.xlu0 %790 }
0x100e   :  { %v793_v19 = vmul.f32 %v1415_v10, %v791_v18 }
0x1010   :  { %797 = vrot.lane.b32.xlu1 %v793_v19, %s1462_s3 }
0x1082   :  { %v798_v20 = vpop.permute.xlu1 %797 }
0x1083   :  { %1278 = vmatmul.mubr.msk.f32.vlgmr.msra.gmra.mrb[12].mxu0 %vm43_vm0, %v798_v20 }
0x1084   :  { %1299 = vmatprep.mubr.msk.f32.mxu0 %vm1459_vm1, %v1460_v13  ;;  %1360 = vmatpush3.bf16.msra.mxu0 %v1359_v52 }
0x1085   :  { %1361 = vmatprep.subr.bf16.mxu0 %v1458_v4 }
0x1088   :  { %1363 = vmatpush3.bf16.msra.mxu0 %v1362_v54 }
0x1156   :  { %v867_v22 = vpop.f32.mrb[12].mxu0 }
0x1157   :  { %v871_v23 = vadd.f32 %v867_v22, %v165_v21  ;;  %v1279_v24 = vpop.f32.mrb[13].mxu0 }
0x1159   :  { %1418 = vtanh.f32 %v871_v23  ;;  %v1121_v26 = vmul.f32 -1.442695, %v871_v23 }
0x115b   :  { %1420 = vpow2.f32 %v1121_v26 }
0x1163   :  { %v1419_v25 = vpop.eup %1418 }
0x1164   :  { %881 = vrot.lane.b32.xlu0 %v1419_v25, %s1461_s17 }
0x1165   :  { %v1421_v27 = vpop.eup %1420 }
0x1166   :  { %v875_v28 = vadd.f32 1.0, %v1421_v27 }
0x1168   :  { %1422 = vrcp.f32 %v875_v28 }
0x1172   :  { %v1423_v29 = vpop.eup %1422 }
0x1173   :  { %v879_v13 = vmul.f32 %v1423_v29, %v787_v62 }
0x11d6   :  { %v882_v30 = vpop.permute.xlu0 %881 }
0x11d7   :  { %v884_v31 = vmul.f32 %v1423_v29, %v882_v30 }
0x11d9   :  { %886 = vrot.lane.b32.xlu1 %v884_v31, %s1462_s3 }
0x124b   :  { %v887_v32 = vpop.permute.xlu1 %886 }
0x124c   :  { %v889_v1 = vadd.f32 %v887_v32, %v879_v13 }
0x124e   :  { %1424 = vtanh.f32 %v889_v1 }
0x1258   :  { %v1425_v33 = vpop.eup %1424 }
0x1259   :  { %892 = vrot.lane.b32.xlu0 %v1425_v33, %s1461_s17 }
0x12cb   :  { %v893_v34 = vpop.permute.xlu0 %892 }
0x12cc   :  { %v895_v35 = vmul.f32 %v1423_v29, %v893_v34 }
0x12ce   :  { %899 = vrot.lane.b32.xlu1 %v895_v35, %s1462_s3 }
0x1340   :  { %v900_v36 = vpop.permute.xlu1 %899 }
0x1341   :  { %1289 = vmatmul.mubr.msk.f32.vlgmr.msra.gmra.mrb[8].mxu1 %vm43_vm0, %v900_v36 }
0x1414   :  { %v969_v38 = vpop.f32.mrb[8].mxu1 }
0x1415   :  { %v973_v39 = vadd.f32 %v969_v38, %v170_v37  ;;  %v1290_v40 = vpop.f32.mrb[9].mxu1 }
0x1417   :  { %1426 = vtanh.f32 %v973_v39  ;;  %v1123_v42 = vmul.f32 -1.442695, %v973_v39 }
0x1419   :  { %1428 = vpow2.f32 %v1123_v42 }
0x1421   :  { %v1427_v41 = vpop.eup %1426 }
0x1422   :  { %983 = vrot.lane.b32.xlu0 %v1427_v41, %s1461_s17 }
0x1423   :  { %v1429_v43 = vpop.eup %1428 }
0x1424   :  { %v977_v44 = vadd.f32 1.0, %v1429_v43 }
0x1426   :  { %1430 = vrcp.f32 %v977_v44 }
0x1430   :  { %v1431_v45 = vpop.eup %1430 }
0x1431   :  { %v981_v48 = vmul.f32 %v1431_v45, %v889_v1 }
0x1494   :  { %v984_v46 = vpop.permute.xlu0 %983 }
0x1495   :  { %v986_v47 = vmul.f32 %v1431_v45, %v984_v46 }
0x1497   :  { %988 = vrot.lane.b32.xlu1 %v986_v47, %s1462_s3 }
0x1509   :  { %v989_v49 = vpop.permute.xlu1 %988 }
0x150a   :  { %v991_v16 = vadd.f32 %v989_v49, %v981_v48 }
0x150c   :  { %1432 = vtanh.f32 %v991_v16 }
0x1516   :  { %v1433_v55 = vpop.eup %1432 }
0x1517   :  { %994 = vrot.lane.b32.xlu0 %v1433_v55, %s1461_s17 }
0x1589   :  { %v995_v56 = vpop.permute.xlu0 %994 }
0x158a   :  { %v997_v57 = vmul.f32 %v1431_v45, %v995_v56 }
0x158c   :  { %1010 = vrot.lane.b32.xlu1 %v997_v57, %s1462_s3 }
0x15fe   :  { %v1011_v58 = vpop.permute.xlu1 %1010 }
0x15ff   :  { %1300 = vmatmul.mubr.msk.f32.vlgmr.msra.gmra.mrb[14].mxu0 %vm43_vm0, %v1011_v58 }
0x16d2   :  { %v1080_v60 = vpop.f32.mrb[14].mxu0 }
0x16d3   :  { %v1081_v4 = vadd.f32 %v1124_v59, %v1080_v60  ;;  %v1301_v61 = vpop.f32.mrb[15].mxu0 }
0x16d5   :  { %1085 = vst.msk [vmem:[#allocation3] sm:$0xff] %vm1084_vm2, %v1081_v4 }
0x16d6   :  { %1445 = shalt.err (!%p1442_p4)
}
0x16d7   :  { %s1446_s17 = scalar_lea.hbm %s1710_s6, 128 }
0x16d8   :  { %p1447_p5 = scmp.ne.s32.totalorder %s1710_s6, %s1446_s17  ;;  %p1450_p6 = scmp.lt.u32.totalorder %s1446_s17, %s1710_s6 }
0x16da   :  { %p1452_p7 = pnand %p1450_p6, %p1447_p5 }
0x16dc   :  { %1455 = shalt.err (!%p1452_p7)
}
0x16dd   :  { %1095 = dma.vmem_to_hbm [thread:$0]  %s1093_s1, 128, %s1710_s6, [#allocation4]  }
0x16de   :  { %1456 = dma.done.wait [#allocation4], 128  }
0x16df   :  { %1457 = vsyncadd [#allocation4], 4294967168 }
0x16e0   :  { %1099 = vsyncpa [#allocation4], 1 }

</bundles_post_ra>
